<compile_context>
chip_gen: v6e
topology: v6e:2x2x1
jax: 0.10.0
libtpu: 0.0.40
codegen_flags: <defaults>
</compile_context>

<pallas_src>
import jax
import jax.numpy as jnp
from jax.experimental import pallas as pl
from jax.experimental.pallas import tpu as pltpu


def _copy_kernel(x_ref, o_ref):
    # Plain lane-dense streaming copy: (tile_rows, W) -> (tile_rows, W).
    o_ref[...] = x_ref[...]


def _sublane_quantum(itemsize: int) -> int:
    # Native packed tile heights: f32 -> 8, bf16 -> 16, int8/fp8 -> 32.
    return max(8, 32 // max(1, itemsize))


def _pick_width(n: int) -> int:
    """Largest lane-dense width (multiple of 128) dividing n (n % 128 == 0)."""
    for w in (2048, 1024, 512, 256, 128):
        if n % w == 0:
            return w
    return 128  # unreachable: caller guarantees n % 128 == 0


def _pick_tile_rows(rows: int, width: int, itemsize: int) -> int:
    """Row tile: dtype-aware sublane multiple, <=4 MiB block, >=2 grid steps
    for large arrays (megacore), ragged last block handled by pl.cdiv."""
    q = _sublane_quantum(itemsize)
    if rows <= q:
        return rows  # full extent along rows — always a legal block shape
    cap_bytes = 4 * 1024 * 1024
    cap_rows = max(q, (cap_bytes // max(1, width * itemsize)) // q * q)
    # Force at least 2 grid iterations when the array can be split: lets
    # ("parallel",) shard the DMA streams across both TensorCores on v7x.
    half = -(-rows // 2)          # cdiv(rows, 2)
    half = -(-half // q) * q      # round up to the sublane quantum
    cap_rows = min(cap_rows, half)
    tile_rows = min(cap_rows, rows)
    tile_rows = max(q, (tile_rows // q) * q)  # multiple of q (ragged tail OK)
    return tile_rows


def _pallas_copy_flat(flat: jax.Array) -> jax.Array:
    """Materialize a copy of a 1-D array via a tiled, lane-dense Pallas kernel."""
    n = flat.shape[0]
    pad = (-n) % 128
    padded = jnp.pad(flat, (0, pad)) if pad else flat
    m = n + pad

    width = _pick_width(m)
    rows = m // width
    itemsize = jnp.dtype(flat.dtype).itemsize
    tile_rows = _pick_tile_rows(rows, width, itemsize)

    x2 = padded.reshape(rows, width)
    grid = (pl.cdiv(rows, tile_rows),)  # ragged last block is masked by Pallas

    out2 = pl.pallas_call(
        _copy_kernel,
        out_shape=jax.ShapeDtypeStruct((rows, width), flat.dtype),
        grid_spec=pltpu.PrefetchScalarGridSpec(
            num_scalar_prefetch=0,
            grid=grid,
            in_specs=[pl.BlockSpec((tile_rows, width), lambda i: (i, 0))],
            out_specs=pl.BlockSpec((tile_rows, width), lambda i: (i, 0)),
        ),
        compiler_params=pltpu.CompilerParams(
            dimension_semantics=("parallel",),
            vmem_limit_bytes=48 << 20,
        ),
    )(x2)

    out_flat = out2.reshape(m)
    return out_flat[:n] if pad else out_flat


def squeeze(x: jax.Array, dim: int = -1, *, materialize: bool = False) -> jax.Array:
    """Equivalent of torch.Tensor.squeeze(dim).

    materialize=False (default): zero-cost metadata reshape — the optimal path.
    materialize=True:  result is produced through the Pallas streaming-copy
                       kernel (lane-dense, tiled, pipelined) — demo path for
                       when a fresh buffer is genuinely required.
    """
    nd = x.ndim
    d = dim % nd
    if x.shape[d] != 1:
        out_shape = x.shape  # torch semantics: non-size-1 dim is untouched
    else:
        out_shape = x.shape[:d] + x.shape[d + 1:]

    if not materialize:
        return x.reshape(out_shape)  # pure metadata — no HBM traffic

    flat = x.reshape(-1)
    return _pallas_copy_flat(flat).reshape(out_shape)


if __name__ == "__main__":
    key = jax.random.PRNGKey(0)

    # Case 1: default dim=-1, (B, C, H, 1) -> (B, C, H), f32, tiny.
    x = jax.random.normal(key, (2, 4, 16, 1), dtype=jnp.float32)
    ref = jnp.squeeze(x, axis=-1)
    out = jax.block_until_ready(squeeze(x, dim=-1, materialize=True))
    assert out.shape == (2, 4, 16), out.shape
    assert out.dtype == x.dtype
    assert bool(jnp.array_equal(out, ref))

    # Case 2: interior dim, element count NOT a multiple of 128 (pad path).
    y = jax.random.normal(jax.random.PRNGKey(1), (3, 5, 1, 7), dtype=jnp.float32)
    out_y = jax.block_until_ready(squeeze(y, dim=2, materialize=True))
    assert out_y.shape == (3, 5, 7)
    assert bool(jnp.array_equal(out_y, jnp.squeeze(y, axis=2)))

    # Case 3: lane-dense tiled path, multiple grid steps possible.
    z = jax.random.normal(jax.random.PRNGKey(2), (2, 4, 16, 128, 1), dtype=jnp.float32)
    out_z = jax.block_until_ready(squeeze(z, dim=-1, materialize=True))
    assert out_z.shape == (2, 4, 16, 128)
    assert bool(jnp.array_equal(out_z, jnp.squeeze(z, axis=-1)))

    # Case 4: bf16 (dtype-aware sublane quantum = 16), interior size-1 dim,
    # large enough that the grid splits into >=2 parallel steps.
    w = (jax.random.normal(jax.random.PRNGKey(3), (4, 1, 64, 256), dtype=jnp.float32)
         .astype(jnp.bfloat16))
    out_w = jax.block_until_ready(squeeze(w, dim=1, materialize=True))
    assert out_w.shape == (4, 64, 256)
    assert bool(jnp.array_equal(out_w, jnp.squeeze(w, axis=1)))

    # Case 5: torch semantics — squeezing a non-size-1 dim is a no-op.
    v = jax.random.normal(jax.random.PRNGKey(4), (2, 3, 4), dtype=jnp.float32)
    out_v = jax.block_until_ready(squeeze(v, dim=1, materialize=True))
    assert out_v.shape == (2, 3, 4)
    assert bool(jnp.array_equal(out_v, v))

    # Default (optimal) zero-copy path sanity check.
    out_fast = jax.block_until_ready(squeeze(x, dim=-1))
    assert bool(jnp.array_equal(out_fast, ref))

    print("KERNEL_OK")
</pallas_src>

<mosaic_0001>
module attributes {stable_mosaic.version = 11 : i64} {
  func.func @_copy_kernel(%arg0: i32, %arg1: memref<1x128xf32, #tpu.memory_space<vmem>>, %arg2: memref<1x128xf32, #tpu.memory_space<vmem>>) attributes {dimension_semantics = [#tpu.dimension_semantics<parallel>], iteration_bounds = array<i64: 1>, scalar_prefetch = 0 : i64, scratch_operands = 0 : i64, tpu.core_type = #tpu.core_type<tc>, window_params = [{transform_indices = @transform_0, window_bounds = array<i64: 1, 128>}, {transform_indices = @transform_1, window_bounds = array<i64: 1, 128>}]} {
    %c0 = arith.constant 0 : index
    %c0_0 = arith.constant 0 : index
    %0 = vector.load %arg1[%c0, %c0_0] : memref<1x128xf32, #tpu.memory_space<vmem>>, vector<1x128xf32>
    %c0_1 = arith.constant 0 : index
    %c0_2 = arith.constant 0 : index
    %1 = vector.load %arg2[%c0_1, %c0_2] : memref<1x128xf32, #tpu.memory_space<vmem>>, vector<1x128xf32>
    tpu.vector_store %arg2[%c0_1, %c0_2], %0 {strides = array<i32>} : memref<1x128xf32, #tpu.memory_space<vmem>>, vector<1x128xf32>,
    return
  }
  func.func @transform_0(%arg0: i32) -> (i32, i32) {
    %c0_i32 = arith.constant 0 : i32
    %c0_i32_0 = arith.constant 0 : i32
    return %arg0, %c0_i32 : i32, i32
  }
  func.func @transform_1(%arg0: i32) -> (i32, i32) {
    %c0_i32 = arith.constant 0 : i32
    %c0_i32_0 = arith.constant 0 : i32
    return %arg0, %c0_i32 : i32, i32
  }
}

</mosaic_0001>

<bundles_post_ra>
// kernel: tpu_custom_call.1
= control target key start
LH: loop header
LB: loop body
LE: loop exit
PB: predicated region body
PF: predicated region fallthrough
CT: control target
= control target key end

     0   :  { %6 = vsyncpa [#allocation3], 0  ;;  %s102_s0 = inlined_call_operand.hbm [shape: f32[1,128], index: 0, kind: input, shape index: {}]   ;;  %s103_s1 = inlined_call_operand.hbm [shape: f32[1,128], index: 1, kind: output, shape index: {}]  }
   0x1   :  { %7 = vsyncpa [#allocation4], 0  ;;  %s84_s6 = smov [#allocation2]  }
   0x2   :  { %s14_s7 = sshll.u32 %s84_s6, 4  ;;  %s15_s7 = int_to_ptr.vmem [resolvable:$true] %s14_s7 }
   0x3   :  { %s48_s8 = scalar_lea.vmem %s15_s7, 16  ;;  %s52_s9 = scalar_lea.vmem %s15_s7, 32 }
   0x4   :  { %p49_p0 = scmp.ne.s32.totalorder %s15_s7, %s48_s8  ;;  %p53_p1 = scmp.lt.s32.totalorder %s15_s7, %s15_s7 }
   0x5   :  { %p54_p2 = scmp.lt.s32.totalorder %s52_s9, %s48_s8 }
   0x7   :  { %p55_p3 = por %p54_p2, %p53_p1 }
   0x9   :  { %p56_p4 = pnand %p55_p3, %p49_p0 }
   0xb   :  { %59 = shalt.err (!%p56_p4)
}
   0xc   :  { %17 = dma.hbm_to_vmem [thread:$0]  %s102_s0, 16, %s15_s7, [#allocation3]  }
   0xd   :  { %80 = dma.done.wait [#allocation3], 16  }
   0xe   :  { %81 = vsyncadd [#allocation3], 4294967280  ;;  %s85_s12 = smov [#allocation5]   ;;  %v21_v0 = vld [vmem:[#allocation2] sm:$0x1] }
   0xf   :  { %s29_s13 = sshll.u32 %s85_s12, 4  ;;  %22 = vst [vmem:[#allocation5] sm:$0x1] %v21_v0  ;;  %s30_s13 = int_to_ptr.vmem [resolvable:$true] %s29_s13 }
  0x10   :  { %s60_s14 = scalar_lea.vmem %s30_s13, 16  ;;  %s64_s15 = scalar_lea.vmem %s30_s13, 32 }
  0x11   :  { %p61_p5 = scmp.ne.s32.totalorder %s30_s13, %s60_s14  ;;  %p65_p6 = scmp.lt.s32.totalorder %s30_s13, %s30_s13 }
  0x12   :  { %p66_p7 = scmp.lt.s32.totalorder %s64_s15, %s60_s14 }
  0x14   :  { %p67_p8 = por %p66_p7, %p65_p6 }
  0x16   :  { %p68_p9 = pnand %p67_p8, %p61_p5 }
  0x18   :  { %71 = shalt.err (!%p68_p9)
}
  0x19   :  { %32 = dma.vmem_to_hbm [thread:$0]  %s30_s13, 16, %s103_s1, [#allocation4]  }
  0x1a   :  { %82 = dma.done.wait [#allocation4], 16  }
  0x1b   :  { %83 = vsyncadd [#allocation4], 4294967280 }
  0x1c   :  { %36 = vsyncpa [#allocation3], 1 }
  0x1d   :  { %37 = vsyncpa [#allocation4], 1 }

</bundles_post_ra>
